<compile_context>
chip_gen: v7x
topology: tpu7x:2x2x1
jax: 0.10.0
libtpu: 0.0.40
codegen_flags: <defaults>
</compile_context>

<pallas_src>
import jax
import jax.numpy as jnp
from jax.experimental import pallas as pl
from jax.experimental.pallas import tpu as pltpu


def frontend_copy_kernel(x_hbm_ref, o_hbm_ref, sem):
    # Abstract forward -> identity: one direct HBM->HBM DMA of the whole
    # mini_batch. No VMEM staging, no grid, no vector load/store path.
    cp = pltpu.make_async_copy(x_hbm_ref, o_hbm_ref, sem)
    cp.start()
    cp.wait()


@jax.jit
def visual_frontend_forward(mini_batch: jax.Array) -> jax.Array:
    """Pallas implementation of VisualFrontend.forward (abstract -> identity)."""
    orig_shape = mini_batch.shape
    dtype = mini_batch.dtype
    total = mini_batch.size
    itemsize = jnp.dtype(dtype).itemsize

    # Free bitcast-reshape to a lane-dense 2D slab when a 128-multiple divides
    # the element count; otherwise a flat 1D view. Either way the DMA copies
    # the buffer verbatim — no masked stores, no padding needed.
    lane = None
    for cand in (1024, 512, 256, 128):
        if total % cand == 0:
            lane = cand
            break
    x = mini_batch.reshape(total // lane, lane) if lane is not None else mini_batch.reshape(total)

    out = pl.pallas_call(
        frontend_copy_kernel,
        out_shape=jax.ShapeDtypeStruct(x.shape, dtype),
        in_specs=[pl.BlockSpec(memory_space=pl.ANY)],
        out_specs=pl.BlockSpec(memory_space=pl.ANY),
        scratch_shapes=[pltpu.SemaphoreType.DMA],
        cost_estimate=pl.CostEstimate(
            flops=0,
            transcendentals=0,
            bytes_accessed=2 * total * itemsize,
        ),
    )(x)

    return out.reshape(orig_shape)


if __name__ == "__main__":
    key = jax.random.PRNGKey(0)
    # Small NCHW mini_batch consistent with a visual frontend input.
    x = jax.random.normal(key, (2, 4, 16, 16), dtype=jnp.float32)

    y = visual_frontend_forward(x)
    y = jax.block_until_ready(y)

    # Sanity check: abstract forward == identity pass-through.
    assert y.shape == x.shape
    assert y.dtype == x.dtype
    assert bool(jnp.allclose(y, x))

    print("KERNEL_OK")
</pallas_src>

<mosaic_0001>
module attributes {stable_mosaic.version = 11 : i64} {
  func.func @frontend_copy_kernel(%arg0: memref<2x1024xf32, #tpu.memory_space<any>>, %arg1: memref<2x1024xf32, #tpu.memory_space<any>>, %arg2: memref<!tpu.dma_semaphore, #tpu.memory_space<semaphore_mem>>) attributes {dimension_semantics = [], scalar_prefetch = 0 : i64, scratch_operands = 1 : i64, tpu.core_type = #tpu.core_type<tc>} {
    tpu.enqueue_dma source(%arg0 : memref<2x1024xf32, #tpu.memory_space<any>>) target(%arg1 : memref<2x1024xf32, #tpu.memory_space<any>>) target_semaphore(%arg2 : memref<!tpu.dma_semaphore, #tpu.memory_space<semaphore_mem>>)
    tpu.wait_dma2 semaphore(%arg2 : memref<!tpu.dma_semaphore, #tpu.memory_space<semaphore_mem>>) src(%arg0 : memref<2x1024xf32, #tpu.memory_space<any>>) dst(%arg1 : memref<2x1024xf32, #tpu.memory_space<any>>)
    return
  }
}

</mosaic_0001>

<bundles_post_ra>
// kernel: visual_frontend_forward.1
= control target key start
LH: loop header
LB: loop body
LE: loop exit
PB: predicated region body
PF: predicated region fallthrough
CT: control target
= control target key end

     0   :  { %s93_s0 = inlined_call_operand.vmem [shape: f32[2,1024], index: 0, kind: input, shape index: {}]   ;;  %s94_s1 = inlined_call_operand.vmem [shape: f32[2,1024], index: 1, kind: output, shape index: {}]  }
   0x1   :  { %v38_v0 = vld [vmem:[%s93_s0] sm:$0xff]  ;;  %v40_v1 = vld [vmem:[%s93_s0 + $0x8] sm:$0xff] }
   0x2   :  { %39 = vst [vmem:[%s94_s1] sm:$0xff] %v38_v0  ;;  %41 = vst [vmem:[%s94_s1 + $0x8] sm:$0xff] %v40_v1 }
   0x3   :  { %49 = vsyncadd [#allocation2], 256 }
   0x4   :  { %69 = dma.done.wait [#allocation2], 256 }
   0x5   :  { %70 = vsyncadd [#allocation2], 4294967040 }
   0x6   :  { %54 = vsyncmov [#allocation2] }
   0x9   :  { %s55_s14 = vpop.sfrf %54 }
   0xa   :  { %p68_p0 = scmp.ne.s32.totalorder %s55_s14, 0 }
   0xc   :  { %59 = shalt.err (%p68_p0)  }

</bundles_post_ra>
